<compile_context>
chip_gen: v7x
topology: tpu7x:2x2x1
jax: 0.10.0
libtpu: 0.0.40
codegen_flags: <defaults>
</compile_context>

<pallas_src>
import math

import jax
import jax.numpy as jnp
from jax.experimental import pallas as pl
from jax.experimental.pallas import tpu as pltpu

LN_EPS = 1e-5
LRELU_SLOPE = 0.2
LANES = 128


def _round_up(x, m):
    return (x + m - 1) // m * m


def _leaky_relu(x, slope=LRELU_SLOPE):
    return jnp.where(x > 0, x, slope * x)


def _layer_norm(x, gamma, beta, eps=LN_EPS):
    # Two-pass variance (more stable than E[x^2] - mean^2), fused affine.
    mean = jnp.mean(x, axis=-1, keepdims=True)
    xc = x - mean
    var = jnp.mean(xc * xc, axis=-1, keepdims=True)
    inv = jax.lax.rsqrt(var + eps)
    return xc * inv * gamma + beta


def _dot_bf16(x_f32, w_bf16):
    # bf16 x bf16 operands, f32 accumulation on the MXU.
    return jnp.dot(x_f32.astype(jnp.bfloat16), w_bf16,
                   preferred_element_type=jnp.float32)


def _make_kernel(noise_dim, label_dim, hidden_dim, output_dim):
    n0, n1 = 0, noise_dim
    l0, l1 = n1, n1 + label_dim
    e0, e1 = l1, l1 + output_dim
    d_pad = _round_up(output_dim, LANES)

    def kernel(packed_ref, wn_ref, wl_ref, wmulv_n_ref, wmulv_l_ref,
               wout_ref, small_ref, out_ref):
        # Single lane-dense load of [noise | labels | eps | pad].
        packed = packed_ref[...]                         # (blk, in_pad) f32
        noise = packed[:, n0:n1]
        labels = packed[:, l0:l1]
        eps = packed[:, e0:e1]

        # Packed small params: rows = [bn, gn, beta_n, bl, gl, beta_l, bmu|blv, bout_pad]
        sp = small_ref[...]                              # (8, SW) f32
        bn, gn, betn = sp[0:1, :hidden_dim], sp[1:2, :hidden_dim], sp[2:3, :hidden_dim]
        bl, gl, betl = sp[3:4, :hidden_dim], sp[4:5, :hidden_dim], sp[5:6, :hidden_dim]
        bmulv = sp[6:7, :2 * output_dim]                 # fused mu|logvar bias
        bout = sp[7:8, :d_pad]                           # lane-padded output bias

        # noise_proj / label_proj: Linear -> LayerNorm -> LeakyReLU(0.2)
        nf = _leaky_relu(_layer_norm(_dot_bf16(noise, wn_ref[...]) + bn, gn, betn))
        lf = _leaky_relu(_layer_norm(_dot_bf16(labels, wl_ref[...]) + bl, gl, betl))

        # mu & logvar fused along N (concat eliminated by splitting along K).
        mulv = (_dot_bf16(nf, wmulv_n_ref[...])
                + _dot_bf16(lf, wmulv_l_ref[...])
                + bmulv)                                 # (blk, 2D) f32
        mu = mulv[:, :output_dim]
        logvar = mulv[:, output_dim:2 * output_dim]

        # reparameterize: z = mu + eps * exp(0.5 * logvar)   (eps passed in)
        z = mu + eps * jnp.exp(0.5 * logvar)

        # output_proj with lane-padded weight -> dense 128-lane store.
        out_ref[...] = _dot_bf16(z, wout_ref[...]) + bout

    return kernel


def global_generator_forward(noise, labels, eps_noise, params, dims, *, block_batch=None):
    """noise: (B, noise_dim), labels: (B, label_dim), eps_noise: (B, output_dim).
    Returns features: (B, output_dim) float32."""
    noise_dim, label_dim, hidden_dim, output_dim = dims
    B = noise.shape[0]
    assert noise.shape == (B, noise_dim)
    assert labels.shape == (B, label_dim)
    assert eps_noise.shape == (B, output_dim)

    wn, wl, wmulv_n, wmulv_l, wout_pad, small = params
    d_pad = wout_pad.shape[1]
    in_width = noise_dim + label_dim + output_dim
    in_pad = _round_up(in_width, LANES)

    # One lane-dense packed input: [noise | labels | eps | zeros] -> one DMA per tile.
    packed = jnp.concatenate(
        [noise.astype(jnp.float32), labels.astype(jnp.float32),
         eps_noise.astype(jnp.float32)], axis=1)
    if in_pad != in_width:
        packed = jnp.pad(packed, ((0, 0), (0, in_pad - in_width)))

    if block_batch is None:
        block_batch = min(B, 1024)
        # Keep >= 2 grid steps when possible so v7x megacore feeds both TCs.
        if B // block_batch < 2 and B % 2 == 0 and (B // 2) % 8 == 0:
            block_batch = B // 2
    assert B % block_batch == 0, (B, block_batch)
    grid = (B // block_batch,)

    def resident(p):
        # Whole array, constant block index => fetched once, stays VMEM-resident.
        return pl.BlockSpec(p.shape, lambda i, nd=p.ndim: (0,) * nd)

    in_specs = ([pl.BlockSpec((block_batch, in_pad), lambda i: (i, 0))]
                + [resident(p) for p in (wn, wl, wmulv_n, wmulv_l, wout_pad, small)])
    out_specs = pl.BlockSpec((block_batch, d_pad), lambda i: (i, 0))

    kernel = _make_kernel(noise_dim, label_dim, hidden_dim, output_dim)

    flops = 2 * B * (noise_dim * hidden_dim + label_dim * hidden_dim
                     + 2 * hidden_dim * 2 * output_dim + output_dim * d_pad)
    transcendentals = B * (output_dim + 2)
    bytes_accessed = (sum(int(p.size) * p.dtype.itemsize for p in params)
                      + packed.size * 4 + B * d_pad * 4)

    out_padded = pl.pallas_call(
        kernel,
        out_shape=jax.ShapeDtypeStruct((B, d_pad), jnp.float32),
        grid=grid,
        in_specs=in_specs,
        out_specs=out_specs,
        compiler_params=pltpu.CompilerParams(
            dimension_semantics=("parallel",),
            vmem_limit_bytes=32 * 1024 * 1024),
        cost_estimate=pl.CostEstimate(
            flops=flops,
            transcendentals=transcendentals,
            bytes_accessed=bytes_accessed),
    )(packed, wn, wl, wmulv_n, wmulv_l, wout_pad, small)

    return out_padded[:, :output_dim]


def init_params(key, noise_dim, label_dim, hidden_dim, output_dim):
    """PyTorch-style init. Linear weights stored transposed to (in, out).
    mu/logvar weights are split along K (the concat axis) and fused along N;
    output_proj weight/bias are zero-padded to a 128-lane multiple; all biases
    and LayerNorm params are packed into one (8, 128*) f32 array."""
    def linear(key, fan_in, fan_out):
        kw, kb = jax.random.split(key)
        bound = 1.0 / math.sqrt(fan_in)
        w = jax.random.uniform(kw, (fan_in, fan_out), jnp.float32, -bound, bound)
        b = jax.random.uniform(kb, (fan_out,), jnp.float32, -bound, bound)
        return w, b

    k1, k2, k3, k4, k5 = jax.random.split(key, 5)
    wn, bn = linear(k1, noise_dim, hidden_dim)
    wl, bl = linear(k2, label_dim, hidden_dim)
    wmu, bmu = linear(k3, 2 * hidden_dim, output_dim)
    wlv, blv = linear(k4, 2 * hidden_dim, output_dim)
    wout, bout = linear(k5, output_dim, output_dim)

    gn = jnp.ones((hidden_dim,), jnp.float32)       # LayerNorm affine defaults
    betn = jnp.zeros((hidden_dim,), jnp.float32)
    gl = jnp.ones((hidden_dim,), jnp.float32)
    betl = jnp.zeros((hidden_dim,), jnp.float32)

    # Split mu/logvar along concat (K) axis, fuse along N -> (H, 2D) each.
    wmulv_n = jnp.concatenate([wmu[:hidden_dim], wlv[:hidden_dim]], axis=1)
    wmulv_l = jnp.concatenate([wmu[hidden_dim:], wlv[hidden_dim:]], axis=1)
    bmulv = jnp.concatenate([bmu, blv], axis=0)

    d_pad = _round_up(output_dim, LANES)
    wout_pad = jnp.pad(wout, ((0, 0), (0, d_pad - output_dim)))
    bout_pad = jnp.pad(bout, (0, d_pad - output_dim))

    sw = _round_up(max(hidden_dim, 2 * output_dim, d_pad), LANES)

    def row(v):
        return jnp.pad(v, (0, sw - v.shape[0]))[None, :]

    small = jnp.concatenate(
        [row(bn), row(gn), row(betn),
         row(bl), row(gl), row(betl),
         row(bmulv), row(bout_pad)], axis=0).astype(jnp.float32)   # (8, sw)

    return (wn.astype(jnp.bfloat16), wl.astype(jnp.bfloat16),
            wmulv_n.astype(jnp.bfloat16), wmulv_l.astype(jnp.bfloat16),
            wout_pad.astype(jnp.bfloat16), small)


def _reference_forward(noise, labels, eps_noise, params, dims):
    """Pure-JAX reference (same bf16 matmul casts) for sanity checking.
    NOTE: PyTorch keeps matmuls in f32; bf16 operands here trade a small amount
    of activation precision for halved weight DMA + native MXU dtype."""
    noise_dim, label_dim, hidden_dim, output_dim = dims
    wn, wl, wmulv_n, wmulv_l, wout_pad, small = params
    bn, gn, betn = small[0, :hidden_dim], small[1, :hidden_dim], small[2, :hidden_dim]
    bl, gl, betl = small[3, :hidden_dim], small[4, :hidden_dim], small[5, :hidden_dim]
    bmulv = small[6, :2 * output_dim]
    bout = small[7, :output_dim]

    def dot(x, w):
        return jnp.dot(x.astype(jnp.bfloat16), w, preferred_element_type=jnp.float32)

    nf = _leaky_relu(_layer_norm(dot(noise, wn) + bn, gn, betn))
    lf = _leaky_relu(_layer_norm(dot(labels, wl) + bl, gl, betl))
    mulv = dot(nf, wmulv_n) + dot(lf, wmulv_l) + bmulv
    mu, logvar = mulv[:, :output_dim], mulv[:, output_dim:2 * output_dim]
    z = mu + eps_noise * jnp.exp(0.5 * logvar)
    return dot(z, wout_pad[:, :output_dim]) + bout


if __name__ == "__main__":
    noise_dim, label_dim, hidden_dim, output_dim = 16, 10, 32, 64
    batch = 16
    dims = (noise_dim, label_dim, hidden_dim, output_dim)

    key = jax.random.PRNGKey(0)
    k_params, k_noise, k_labels, k_eps = jax.random.split(key, 4)
    params = init_params(k_params, *dims)
    noise = jax.random.normal(k_noise, (batch, noise_dim), jnp.float32)
    labels = jax.random.normal(k_labels, (batch, label_dim), jnp.float32)
    # Explicit eps for reparameterize (stands in for torch.randn_like).
    eps_noise = jax.random.normal(k_eps, (batch, output_dim), jnp.float32)

    feats = global_generator_forward(noise, labels, eps_noise, params, dims)
    jax.block_until_ready(feats)

    assert feats.shape == (batch, output_dim), feats.shape
    ref = _reference_forward(noise, labels, eps_noise, params, dims)
    max_err = float(jnp.max(jnp.abs(feats - ref)))
    assert jnp.allclose(feats, ref, atol=2e-3, rtol=2e-3), f"mismatch, max_err={max_err}"

    print("KERNEL_OK")
</pallas_src>

<mosaic_0001>
module attributes {stable_mosaic.version = 11 : i64} {
  func.func @kernel(%arg0: i32, %arg1: memref<8x128xf32, #tpu.memory_space<vmem>>, %arg2: memref<16x32xbf16, #tpu.memory_space<vmem>>, %arg3: memref<10x32xbf16, #tpu.memory_space<vmem>>, %arg4: memref<32x128xbf16, #tpu.memory_space<vmem>>, %arg5: memref<32x128xbf16, #tpu.memory_space<vmem>>, %arg6: memref<64x128xbf16, #tpu.memory_space<vmem>>, %arg7: memref<8x128xf32, #tpu.memory_space<vmem>>, %arg8: memref<8x128xf32, #tpu.memory_space<vmem>>) attributes {dimension_semantics = [#tpu.dimension_semantics<parallel>], iteration_bounds = array<i64: 2>, scalar_prefetch = 0 : i64, scratch_operands = 0 : i64, tpu.core_type = #tpu.core_type<tc>, window_params = [{transform_indices = @transform_0, window_bounds = array<i64: 8, 128>}, {pipeline_mode = #tpu.pipeline_mode<synchronous>, transform_indices = @transform_1, window_bounds = array<i64: 16, 32>}, {pipeline_mode = #tpu.pipeline_mode<synchronous>, transform_indices = @transform_2, window_bounds = array<i64: 10, 32>}, {pipeline_mode = #tpu.pipeline_mode<synchronous>, transform_indices = @transform_3, window_bounds = array<i64: 32, 128>}, {pipeline_mode = #tpu.pipeline_mode<synchronous>, transform_indices = @transform_4, window_bounds = array<i64: 32, 128>}, {pipeline_mode = #tpu.pipeline_mode<synchronous>, transform_indices = @transform_5, window_bounds = array<i64: 64, 128>}, {pipeline_mode = #tpu.pipeline_mode<synchronous>, transform_indices = @transform_6, window_bounds = array<i64: 8, 128>}, {transform_indices = @transform_7, window_bounds = array<i64: 8, 128>}]} {
    %c0 = arith.constant 0 : index
    %c0_0 = arith.constant 0 : index
    %0 = vector.load %arg1[%c0, %c0_0] : memref<8x128xf32, #tpu.memory_space<vmem>>, vector<8x128xf32>
    %1 = vector.extract_strided_slice %0 {offsets = [0, 0], sizes = [8, 16], strides = [1, 1]} : vector<8x128xf32> to vector<8x16xf32>
    %2 = vector.extract_strided_slice %0 {offsets = [0, 16], sizes = [8, 10], strides = [1, 1]} : vector<8x128xf32> to vector<8x10xf32>
    %3 = vector.extract_strided_slice %0 {offsets = [0, 26], sizes = [8, 64], strides = [1, 1]} : vector<8x128xf32> to vector<8x64xf32>
    %c0_1 = arith.constant 0 : index
    %c0_2 = arith.constant 0 : index
    %4 = vector.load %arg7[%c0_1, %c0_2] : memref<8x128xf32, #tpu.memory_space<vmem>>, vector<8x128xf32>
    %5 = vector.extract_strided_slice %4 {offsets = [0, 0], sizes = [1, 32], strides = [1, 1]} : vector<8x128xf32> to vector<1x32xf32>
    %6 = vector.extract_strided_slice %4 {offsets = [1, 0], sizes = [1, 32], strides = [1, 1]} : vector<8x128xf32> to vector<1x32xf32>
    %7 = vector.extract_strided_slice %4 {offsets = [2, 0], sizes = [1, 32], strides = [1, 1]} : vector<8x128xf32> to vector<1x32xf32>
    %8 = vector.extract_strided_slice %4 {offsets = [3, 0], sizes = [1, 32], strides = [1, 1]} : vector<8x128xf32> to vector<1x32xf32>
    %9 = vector.extract_strided_slice %4 {offsets = [4, 0], sizes = [1, 32], strides = [1, 1]} : vector<8x128xf32> to vector<1x32xf32>
    %10 = vector.extract_strided_slice %4 {offsets = [5, 0], sizes = [1, 32], strides = [1, 1]} : vector<8x128xf32> to vector<1x32xf32>
    %11 = vector.extract_strided_slice %4 {offsets = [6, 0], sizes = [1, 128], strides = [1, 1]} : vector<8x128xf32> to vector<1x128xf32>
    %12 = vector.extract_strided_slice %4 {offsets = [7, 0], sizes = [1, 128], strides = [1, 1]} : vector<8x128xf32> to vector<1x128xf32>
    %c0_3 = arith.constant 0 : index
    %c0_4 = arith.constant 0 : index
    %13 = vector.load %arg2[%c0_3, %c0_4] : memref<16x32xbf16, #tpu.memory_space<vmem>>, vector<16x32xbf16>
    %14 = arith.truncf %1 : vector<8x16xf32> to vector<8x16xbf16>
    %cst = arith.constant dense<0.000000e+00> : vector<8x32xf32>
    %15 = tpu.matmul %14, %13, %cst {dimension_numbers = #tpu.dot_dimension_numbers<[1], [0], [0], [1], [0, 0, 1, 1], [], []>} : vector<8x16xbf16>, vector<16x32xbf16>, vector<8x32xf32> -> vector<8x32xf32>
    %16 = vector.broadcast %5 : vector<1x32xf32> to vector<8x32xf32>
    %17 = arith.addf %15, %16 : vector<8x32xf32>
    %cst_5 = arith.constant dense<0.000000e+00> : vector<8xf32>
    %18 = vector.multi_reduction <add>, %17, %cst_5 [1] : vector<8x32xf32> to vector<8xf32>
    %19 = vector.shape_cast %18 : vector<8xf32> to vector<8x1xf32>
    %cst_6 = arith.constant 3.200000e+01 : f32
    %20 = vector.broadcast %cst_6 : f32 to vector<8x1xf32>
    %21 = arith.divf %19, %20 : vector<8x1xf32>
    %22 = vector.broadcast %21 : vector<8x1xf32> to vector<8x32xf32>
    %23 = arith.subf %17, %22 : vector<8x32xf32>
    %24 = arith.mulf %23, %23 : vector<8x32xf32>
    %cst_7 = arith.constant dense<0.000000e+00> : vector<8xf32>
    %25 = vector.multi_reduction <add>, %24, %cst_7 [1] : vector<8x32xf32> to vector<8xf32>
    %26 = vector.shape_cast %25 : vector<8xf32> to vector<8x1xf32>
    %cst_8 = arith.constant 3.200000e+01 : f32
    %27 = vector.broadcast %cst_8 : f32 to vector<8x1xf32>
    %28 = arith.divf %26, %27 : vector<8x1xf32>
    %cst_9 = arith.constant 9.99999974E-6 : f32
    %29 = vector.broadcast %cst_9 : f32 to vector<8x1xf32>
    %30 = arith.addf %28, %29 : vector<8x1xf32>
    %31 = math.rsqrt %30 : vector<8x1xf32>
    %32 = vector.broadcast %31 : vector<8x1xf32> to vector<8x32xf32>
    %33 = arith.mulf %23, %32 : vector<8x32xf32>
    %34 = vector.broadcast %6 : vector<1x32xf32> to vector<8x32xf32>
    %35 = arith.mulf %33, %34 : vector<8x32xf32>
    %36 = vector.broadcast %7 : vector<1x32xf32> to vector<8x32xf32>
    %37 = arith.addf %35, %36 : vector<8x32xf32>
    %cst_10 = arith.constant 0.000000e+00 : f32
    %38 = vector.broadcast %cst_10 : f32 to vector<8x32xf32>
    %39 = arith.cmpf ogt, %37, %38 : vector<8x32xf32>
    %cst_11 = arith.constant 2.000000e-01 : f32
    %40 = vector.broadcast %cst_11 : f32 to vector<8x32xf32>
    %41 = arith.mulf %40, %37 : vector<8x32xf32>
    %42 = arith.select %39, %37, %41 : vector<8x32xi1>, vector<8x32xf32>
    %c0_12 = arith.constant 0 : index
    %c0_13 = arith.constant 0 : index
    %43 = vector.load %arg3[%c0_12, %c0_13] : memref<10x32xbf16, #tpu.memory_space<vmem>>, vector<10x32xbf16>
    %44 = arith.truncf %2 : vector<8x10xf32> to vector<8x10xbf16>
    %cst_14 = arith.constant dense<0.000000e+00> : vector<8x32xf32>
    %45 = tpu.matmul %44, %43, %cst_14 {dimension_numbers = #tpu.dot_dimension_numbers<[1], [0], [0], [1], [0, 0, 1, 1], [], []>} : vector<8x10xbf16>, vector<10x32xbf16>, vector<8x32xf32> -> vector<8x32xf32>
    %46 = vector.broadcast %8 : vector<1x32xf32> to vector<8x32xf32>
    %47 = arith.addf %45, %46 : vector<8x32xf32>
    %cst_15 = arith.constant dense<0.000000e+00> : vector<8xf32>
    %48 = vector.multi_reduction <add>, %47, %cst_15 [1] : vector<8x32xf32> to vector<8xf32>
    %49 = vector.shape_cast %48 : vector<8xf32> to vector<8x1xf32>
    %cst_16 = arith.constant 3.200000e+01 : f32
    %50 = vector.broadcast %cst_16 : f32 to vector<8x1xf32>
    %51 = arith.divf %49, %50 : vector<8x1xf32>
    %52 = vector.broadcast %51 : vector<8x1xf32> to vector<8x32xf32>
    %53 = arith.subf %47, %52 : vector<8x32xf32>
    %54 = arith.mulf %53, %53 : vector<8x32xf32>
    %cst_17 = arith.constant dense<0.000000e+00> : vector<8xf32>
    %55 = vector.multi_reduction <add>, %54, %cst_17 [1] : vector<8x32xf32> to vector<8xf32>
    %56 = vector.shape_cast %55 : vector<8xf32> to vector<8x1xf32>
    %cst_18 = arith.constant 3.200000e+01 : f32
    %57 = vector.broadcast %cst_18 : f32 to vector<8x1xf32>
    %58 = arith.divf %56, %57 : vector<8x1xf32>
    %cst_19 = arith.constant 9.99999974E-6 : f32
    %59 = vector.broadcast %cst_19 : f32 to vector<8x1xf32>
    %60 = arith.addf %58, %59 : vector<8x1xf32>
    %61 = math.rsqrt %60 : vector<8x1xf32>
    %62 = vector.broadcast %61 : vector<8x1xf32> to vector<8x32xf32>
    %63 = arith.mulf %53, %62 : vector<8x32xf32>
    %64 = vector.broadcast %9 : vector<1x32xf32> to vector<8x32xf32>
    %65 = arith.mulf %63, %64 : vector<8x32xf32>
    %66 = vector.broadcast %10 : vector<1x32xf32> to vector<8x32xf32>
    %67 = arith.addf %65, %66 : vector<8x32xf32>
    %cst_20 = arith.constant 0.000000e+00 : f32
    %68 = vector.broadcast %cst_20 : f32 to vector<8x32xf32>
    %69 = arith.cmpf ogt, %67, %68 : vector<8x32xf32>
    %cst_21 = arith.constant 2.000000e-01 : f32
    %70 = vector.broadcast %cst_21 : f32 to vector<8x32xf32>
    %71 = arith.mulf %70, %67 : vector<8x32xf32>
    %72 = arith.select %69, %67, %71 : vector<8x32xi1>, vector<8x32xf32>
    %c0_22 = arith.constant 0 : index
    %c0_23 = arith.constant 0 : index
    %73 = vector.load %arg4[%c0_22, %c0_23] : memref<32x128xbf16, #tpu.memory_space<vmem>>, vector<32x128xbf16>
    %74 = arith.truncf %42 : vector<8x32xf32> to vector<8x32xbf16>
    %cst_24 = arith.constant dense<0.000000e+00> : vector<8x128xf32>
    %75 = tpu.matmul %74, %73, %cst_24 {dimension_numbers = #tpu.dot_dimension_numbers<[1], [0], [0], [1], [0, 0, 1, 1], [], []>} : vector<8x32xbf16>, vector<32x128xbf16>, vector<8x128xf32> -> vector<8x128xf32>
    %c0_25 = arith.constant 0 : index
    %c0_26 = arith.constant 0 : index
    %76 = vector.load %arg5[%c0_25, %c0_26] : memref<32x128xbf16, #tpu.memory_space<vmem>>, vector<32x128xbf16>
    %77 = arith.truncf %72 : vector<8x32xf32> to vector<8x32xbf16>
    %cst_27 = arith.constant dense<0.000000e+00> : vector<8x128xf32>
    %78 = tpu.matmul %77, %76, %cst_27 {dimension_numbers = #tpu.dot_dimension_numbers<[1], [0], [0], [1], [0, 0, 1, 1], [], []>} : vector<8x32xbf16>, vector<32x128xbf16>, vector<8x128xf32> -> vector<8x128xf32>
    %79 = arith.addf %75, %78 : vector<8x128xf32>
    %80 = vector.broadcast %11 : vector<1x128xf32> to vector<8x128xf32>
    %81 = arith.addf %79, %80 : vector<8x128xf32>
    %82 = vector.extract_strided_slice %81 {offsets = [0, 0], sizes = [8, 64], strides = [1, 1]} : vector<8x128xf32> to vector<8x64xf32>
    %83 = vector.extract_strided_slice %81 {offsets = [0, 64], sizes = [8, 64], strides = [1, 1]} : vector<8x128xf32> to vector<8x64xf32>
    %cst_28 = arith.constant 5.000000e-01 : f32
    %84 = vector.broadcast %cst_28 : f32 to vector<8x64xf32>
    %85 = arith.mulf %84, %83 : vector<8x64xf32>
    %86 = math.exp %85 : vector<8x64xf32>
    %87 = arith.mulf %3, %86 : vector<8x64xf32>
    %88 = arith.addf %82, %87 : vector<8x64xf32>
    %c0_29 = arith.constant 0 : index
    %c0_30 = arith.constant 0 : index
    %89 = vector.load %arg6[%c0_29, %c0_30] : memref<64x128xbf16, #tpu.memory_space<vmem>>, vector<64x128xbf16>
    %90 = arith.truncf %88 : vector<8x64xf32> to vector<8x64xbf16>
    %cst_31 = arith.constant dense<0.000000e+00> : vector<8x128xf32>
    %91 = tpu.matmul %90, %89, %cst_31 {dimension_numbers = #tpu.dot_dimension_numbers<[1], [0], [0], [1], [0, 0, 1, 1], [], []>} : vector<8x64xbf16>, vector<64x128xbf16>, vector<8x128xf32> -> vector<8x128xf32>
    %92 = vector.broadcast %12 : vector<1x128xf32> to vector<8x128xf32>
    %93 = arith.addf %91, %92 : vector<8x128xf32>
    %c0_32 = arith.constant 0 : index
    %c0_33 = arith.constant 0 : index
    %94 = vector.load %arg8[%c0_32, %c0_33] : memref<8x128xf32, #tpu.memory_space<vmem>>, vector<8x128xf32>
    tpu.vector_store %arg8[%c0_32, %c0_33], %93 {strides = array<i32>} : memref<8x128xf32, #tpu.memory_space<vmem>>, vector<8x128xf32>,
    return
  }
  func.func @transform_0(%arg0: i32) -> (i32, i32) {
    %c0_i32 = arith.constant 0 : i32
    %c0_i32_0 = arith.constant 0 : i32
    return %arg0, %c0_i32 : i32, i32
  }
  func.func @transform_1(%arg0: i32) -> (i32, i32) {
    %c0_i32 = arith.constant 0 : i32
    %c0_i32_0 = arith.constant 0 : i32
    %c0_i32_1 = arith.constant 0 : i32
    return %c0_i32, %c0_i32_0 : i32, i32
  }
  func.func @transform_2(%arg0: i32) -> (i32, i32) {
    %c0_i32 = arith.constant 0 : i32
    %c0_i32_0 = arith.constant 0 : i32
    %c0_i32_1 = arith.constant 0 : i32
    return %c0_i32, %c0_i32_0 : i32, i32
  }
  func.func @transform_3(%arg0: i32) -> (i32, i32) {
    %c0_i32 = arith.constant 0 : i32
    %c0_i32_0 = arith.constant 0 : i32
    %c0_i32_1 = arith.constant 0 : i32
    return %c0_i32, %c0_i32_0 : i32, i32
  }
  func.func @transform_4(%arg0: i32) -> (i32, i32) {
    %c0_i32 = arith.constant 0 : i32
    %c0_i32_0 = arith.constant 0 : i32
    %c0_i32_1 = arith.constant 0 : i32
    return %c0_i32, %c0_i32_0 : i32, i32
  }
  func.func @transform_5(%arg0: i32) -> (i32, i32) {
    %c0_i32 = arith.constant 0 : i32
    %c0_i32_0 = arith.constant 0 : i32
    %c0_i32_1 = arith.constant 0 : i32
    return %c0_i32, %c0_i32_0 : i32, i32
  }
  func.func @transform_6(%arg0: i32) -> (i32, i32) {
    %c0_i32 = arith.constant 0 : i32
    %c0_i32_0 = arith.constant 0 : i32
    %c0_i32_1 = arith.constant 0 : i32
    return %c0_i32, %c0_i32_0 : i32, i32
  }
  func.func @transform_7(%arg0: i32) -> (i32, i32) {
    %c0_i32 = arith.constant 0 : i32
    %c0_i32_0 = arith.constant 0 : i32
    return %arg0, %c0_i32 : i32, i32
  }
}

</mosaic_0001>

<bundles_post_ra>
// kernel: tpu_custom_call.1
= control target key start
LH: loop header
LB: loop body
LE: loop exit
PB: predicated region body
PF: predicated region fallthrough
CT: control target
= control target key end

     0   :  { %12 = vsyncpa [#allocation3], 0  ;;  %s1780_s0 = inlined_call_operand.hbm [shape: f32[16,128], index: 0, kind: input, shape index: {}]   ;;  %s1781_s1 = inlined_call_operand.hbm [shape: bf16[16,32], index: 1, kind: input, shape index: {}]   ;;  %s1782_s2 = inlined_call_operand.hbm [shape: bf16[10,32], index: 2, kind: input, shape index: {}]   ;;  %s1783_s3 = inlined_call_operand.hbm [shape: bf16[32,128], index: 3, kind: input, shape index: {}]   ;;  %s1784_s4 = inlined_call_operand.hbm [shape: bf16[32,128], index: 4, kind: input, shape index: {}]   ;;  %s1785_s5 = inlined_call_operand.hbm [shape: bf16[64,128], index: 5, kind: input, shape index: {}]   ;;  %s1786_s6 = inlined_call_operand.vmem [shape: f32[8,128], index: 6, kind: input, shape index: {}]   ;;  %s1787_s7 = inlined_call_operand.hbm [shape: f32[16,128], index: 7, kind: output, shape index: {}]  }
   0x1   :  { %14 = vsyncpa [#allocation3 + $0x1], 0 }
   0x2   :  { %15 = vsyncpa [#allocation6], 0 }
   0x3   :  { %16 = vsyncpa [#allocation9], 0 }
   0x4   :  { %17 = vsyncpa [#allocation12], 0 }
   0x5   :  { %18 = vsyncpa [#allocation4], 0 }
   0x6   :  { %20 = vsyncpa [#allocation4 + $0x1], 0  ;;  %s1411_s24 = smov 0   ;;  %s1413_s25 = smov 0  }
   0x7   :  { %s1415_s26 = smov 0   ;;  %s1417_s27 = smov 0  }
   0x8 LB: > { %s1357_s28 = smov [#allocation5]   ;;  %s1432_s30 = sadd.s32 4294967295, %s1355_s27   ;;  %s1355_s27 = sphi %s1417_s27, %s1812_s27   ;;  %s1351_s26 = sphi %s1415_s26, %s1811_s26   ;;  %s1347_s25 = sphi %s1413_s25, %s1810_s25   ;;  %s1343_s24 = sphi %s1411_s24, %s1809_s24  }
   0x9   : > { %s221_s29 = sshll.u32 %s1357_s28, 4  ;;  %p896_p0 = scmp.ge.s32.totalorder %s1355_s27, 1  ;;  %s1437_s29 = int_to_ptr.vmem [resolvable:$true] %s221_s29 }
   0xa   : > { %p1788_p1 = scmp.eq.s32.totalorder %s1432_s30, 0  ;;  %p209_p2 = scmp.lt.s32.totalorder %s1355_s27, 3 }
   0xb   : > { %s1358_s9 = smov [#allocation8]   ;;  %s1359_s12 = smov [#allocation7]  }
   0xc   : > { %p1439_p3 = pnand %p896_p0, %p209_p2  ;;  %s247_s10 = sshll.u32 %s1358_s9, 4  ;;  %s1452_s10 = int_to_ptr.vmem [resolvable:$true] %s247_s10 }
   0xd   : > { %s234_s13 = sshll.u32 %s1359_s12, 4  ;;  %s1107_s16 = scalar_lea.hbm %s1781_s1, 128  ;;  %s1454_s13 = int_to_ptr.vmem [resolvable:$true] %s234_s13 }
   0xe   : > { %s1791_s8 = scalar_select %p1439_p3, 1, 0 }
   0xf   : > { %p1011_p5 = pneg %p1439_p3  ;;  %p1108_p7 = scmp.ne.s32.totalorder %s1781_s1, %s1107_s16 }
  0x10   : > { %p1114_p11 = scmp.lt.u32.totalorder %s1107_s16, %s1781_s1 }
  0x11   : > { %p1448_p6 = pnand %p1011_p5, %p1788_p1 }
  0x13   : > { %p1464_p8 = pneg %p1448_p6 }
  0x15   : > { %p1110_p9 = pnand %p1464_p8, %p1108_p7 }
  0x17   : > { %p1111_p10 = pneg %p1110_p9 }
  0x19   : > { %p1116_p12 = pnand %p1114_p11, %p1111_p10 }
  0x1b   : > { %1119 = shalt.err (!%p1116_p12)
}
  0x1c   : > { %s1120_s22 = scalar_lea.vmem %s1437_s29, 128  ;;  %p1128_p5 = scmp.lt.s32.totalorder %s1437_s29, %s1437_s29 }
  0x1d   : > { %p1121_p13 = scmp.ne.s32.totalorder %s1437_s29, %s1120_s22  ;;  %p1129_p4 = scmp.lt.s32.totalorder %s1120_s22, %s1120_s22 }
  0x1f   : > { %p1123_p0 = pnand %p1121_p13, %p1464_p8  ;;  %p1130_p7 = por %p1129_p4, %p1128_p5 }
  0x21   : > { %p1124_p2 = pneg %p1123_p0 }
  0x23   : > { %p1131_p9 = pnand %p1130_p7, %p1124_p2 }
  0x25   : > { %1134 = shalt.err (!%p1131_p9)
}
  0x26   : > { %s1360_s23 = smov 64   ;;  %s1361_s28 = smov 4  }
  0x27   : > { %1014 = dma.hbm_to_vmem [thread:$0]  (!%p1448_p6), %s1781_s1, 128, %s1437_s29, [#allocation6], %s1360_s23, %s1360_s23, %s1361_s28  }
  0x28   : > { %s1135_s16 = scalar_lea.hbm %s1783_s3, 256 }
  0x29   : > { %p1136_p4 = scmp.ne.s32.totalorder %s1783_s3, %s1135_s16  ;;  %p1142_p12 = scmp.lt.u32.totalorder %s1135_s16, %s1783_s3 }
  0x2b   : > { %p1138_p10 = pnand %p1136_p4, %p1464_p8 }
  0x2d   : > { %p1139_p11 = pneg %p1138_p10 }
  0x2f   : > { %p1144_p13 = pnand %p1142_p12, %p1139_p11 }
  0x31   : > { %1147 = shalt.err (!%p1144_p13)
}
  0x32   : > { %s1148_s29 = scalar_lea.vmem %s1452_s10, 256  ;;  %p1156_p7 = scmp.lt.s32.totalorder %s1452_s10, %s1452_s10 }
  0x33   : > { %p1149_p0 = scmp.ne.s32.totalorder %s1452_s10, %s1148_s29  ;;  %p1157_p9 = scmp.lt.s32.totalorder %s1148_s29, %s1148_s29 }
  0x35   : > { %p1151_p2 = pnand %p1149_p0, %p1464_p8  ;;  %p1158_p4 = por %p1157_p9, %p1156_p7 }
  0x37   : > { %p1152_p5 = pneg %p1151_p2 }
  0x39   : > { %p1159_p10 = pnand %p1158_p4, %p1152_p5 }
  0x3b   : > { %1162 = shalt.err (!%p1159_p10)
}
  0x3c   : > { %1020 = dma.hbm_to_vmem [thread:$0]  (!%p1448_p6), %s1783_s3, 256, %s1452_s10, [#allocation9], %s1360_s23, %s1360_s23, %s1361_s28  }
  0x3d   : > { %s1163_s15 = scalar_lea.hbm %s1782_s2, 128 }
  0x3e   : > { %p1164_p11 = scmp.ne.s32.totalorder %s1782_s2, %s1163_s15  ;;  %p1170_p0 = scmp.lt.u32.totalorder %s1163_s15, %s1782_s2 }
  0x40   : > { %p1166_p12 = pnand %p1164_p11, %p1464_p8 }
  0x42   : > { %p1167_p13 = pneg %p1166_p12 }
  0x44   : > { %p1172_p2 = pnand %p1170_p0, %p1167_p13 }
  0x46   : > { %1175 = shalt.err (!%p1172_p2)
}
  0x47   : > { %s1176_s10 = scalar_lea.vmem %s1454_s13, 128  ;;  %p1184_p4 = scmp.lt.s32.totalorder %s1454_s13, %s1454_s13 }
  0x48   : > { %p1177_p5 = scmp.ne.s32.totalorder %s1454_s13, %s1176_s10  ;;  %p1185_p10 = scmp.lt.s32.totalorder %s1176_s10, %s1176_s10 }
  0x4a   : > { %p1179_p7 = pnand %p1177_p5, %p1464_p8  ;;  %p1186_p11 = por %p1185_p10, %p1184_p4 }
  0x4c   : > { %p1180_p9 = pneg %p1179_p7 }
  0x4e   : > { %p1187_p12 = pnand %p1186_p11, %p1180_p9 }
  0x50   : > { %1190 = shalt.err (!%p1187_p12)
}
  0x51   : > { %1017 = dma.hbm_to_vmem [thread:$0]  (!%p1448_p6), %s1782_s2, 128, %s1454_s13, [#allocation6], %s1360_s23, %s1360_s23, %s1361_s28  }
  0x52   : > { %s1362_s22 = smov [#allocation10]   ;;  %s1363_s12 = smov [#allocation11]  }
  0x53   : > { %s260_s9 = sshll.u32 %s1362_s22, 4  ;;  %s273_s14 = sshll.u32 %s1363_s12, 4  ;;  %s261_s9 = int_to_ptr.vmem [resolvable:$true] %s260_s9  ;;  %s274_s14 = int_to_ptr.vmem [resolvable:$true] %s273_s14 }
  0x54   : > { %s1191_s17 = scalar_lea.hbm %s1784_s4, 256 }
  0x55   : > { %p1192_p13 = scmp.ne.s32.totalorder %s1784_s4, %s1191_s17  ;;  %p1198_p5 = scmp.lt.u32.totalorder %s1191_s17, %s1784_s4 }
  0x57   : > { %p1194_p0 = pnand %p1192_p13, %p1464_p8 }
  0x59   : > { %p1195_p2 = pneg %p1194_p0 }
  0x5b   : > { %p1200_p7 = pnand %p1198_p5, %p1195_p2 }
  0x5d   : > { %1203 = shalt.err (!%p1200_p7)
}
  0x5e   : > { %s1204_s13 = scalar_lea.vmem %s261_s9, 256  ;;  %p1212_p11 = scmp.lt.s32.totalorder %s261_s9, %s261_s9 }
  0x5f   : > { %p1205_p9 = scmp.ne.s32.totalorder %s261_s9, %s1204_s13  ;;  %p1213_p12 = scmp.lt.s32.totalorder %s1204_s13, %s1204_s13 }
  0x61   : > { %p1207_p4 = pnand %p1205_p9, %p1464_p8  ;;  %p1214_p1 = por %p1213_p12, %p1212_p11 }
  0x63   : > { %p1208_p10 = pneg %p1207_p4 }
  0x65   : > { %p1215_p3 = pnand %p1214_p1, %p1208_p10 }
  0x67   : > { %1218 = shalt.err (!%p1215_p3)
}
  0x68   : > { %1023 = dma.hbm_to_vmem [thread:$0]  (!%p1448_p6), %s1784_s4, 256, %s261_s9, [#allocation9], %s1360_s23, %s1360_s23, %s1361_s28  }
  0x69   : > { %s1219_s16 = scalar_lea.hbm %s1785_s5, 512 }
  0x6a   : > { %p1220_p1 = scmp.ne.s32.totalorder %s1785_s5, %s1219_s16  ;;  %p1226_p0 = scmp.lt.u32.totalorder %s1219_s16, %s1785_s5 }
  0x6c   : > { %p1222_p3 = pnand %p1220_p1, %p1464_p8 }
  0x6e   : > { %p1223_p13 = pneg %p1222_p3 }
  0x70   : > { %p1228_p2 = pnand %p1226_p0, %p1223_p13 }
  0x72   : > { %1231 = shalt.err (!%p1228_p2)
}
  0x73   : > { %s1232_s21 = scalar_lea.vmem %s274_s14, 512  ;;  %p1240_p4 = scmp.lt.s32.totalorder %s274_s14, %s274_s14 }
  0x74   : > { %p1233_p5 = scmp.ne.s32.totalorder %s274_s14, %s1232_s21  ;;  %p1241_p10 = scmp.lt.s32.totalorder %s1232_s21, %s1232_s21 }
  0x76   : > { %p1235_p7 = pnand %p1233_p5, %p1464_p8  ;;  %p1242_p11 = por %p1241_p10, %p1240_p4 }
  0x78   : > { %p1236_p9 = pneg %p1235_p7 }
  0x7a   : > { %p1243_p12 = pnand %p1242_p11, %p1236_p9 }
  0x7c   : > { %1246 = shalt.err (!%p1243_p12)
}
  0x7d   : > { %1026 = dma.hbm_to_vmem [thread:$0]  (!%p1448_p6), %s1785_s5, 512, %s274_s14, [#allocation12], %s1360_s23, %s1360_s23, %s1361_s28  }
  0x7e   : > { %s895_s11 = sadd.s32 4294967294, %s1355_s27   ;;  %s1584_s19 = sadd.s32 1, %s1355_s27  }
  0x7f   : > { %s33_s29 = sadd.s32 1, %s1351_s26  ;;  %s30_s22 = ssub.s32 %s1355_s27, %s1584_s19 }
  0x80   : > { %p40_p8 = scmp.ne.s32.totalorder %s1351_s26, %s1347_s25  ;;  %p31_p1 = scmp.eq.s32.totalorder %s30_s22, 0 }
  0x81   : > { %p41_p3 = scmp.eq.s32.totalorder %s1355_s27, 0  ;;  %p46_p13 = scmp.ne.s32.totalorder %s1347_s25, %s1343_s24 }
  0x82   : > { %p196_p0 = scmp.eq.s32.totalorder %s1432_s30, 1  ;;  %p1794_p5 = scmp.eq.s32.totalorder %s1432_s30, 0 }
  0x83   : > { %s1596_s12 = scalar_select %p31_p1, %s1351_s26, %s33_s29  }
  0x84   : > { %p42_p2 = por %p41_p3, %p40_p8  ;;  %p1600_p7 = por %p1794_p5, %p46_p13 }
  0x85   : > { %p1604_p6 = por %p196_p0, %p40_p8  ;;  %p202_p9 = scmp.eq.s32.totalorder %s895_s11, 1 }
  0x86   : > { %p1040_p4 = scmp.lt.s32.totalorder %s1355_s27, 2  ;;  %s290_s28 = sand.u32 1, %s1351_s26  }
  0x87   : > { %s1796_s23 = scalar_select %p1604_p6, 1, 0 }
  0x88   : > { %p1610_p10 = por %p202_p9, %p46_p13  ;;  %s903_s16 = sshll.u32 %s290_s28, 3 }
  0x89   : > { %s904_s17 = sshll.u32 %s1355_s27, 7  ;;  %s294_s21 = scalar_lea.vmem [#allocation2], %s903_s16 }
  0x8a   : > { %s1797_s14 = scalar_select %p1610_p10, 1, 0 }
  0x8b   : > { %s1618_s10 = scalar_lea.hbm %s1780_s0, %s904_s17  ;;  %s301_s9 = sshll.u32 %s294_s21, 4  ;;  %s1624_s9 = int_to_ptr.vmem [resolvable:$true] %s301_s9 }
  0x8c   : > { %p1620_p11 = pnand %p1040_p4, %p42_p2  ;;  %s291_s11 = scalar_lea.sflag [#allocation3], %s290_s28 }
  0x8d   : > { %s1247_s29 = scalar_lea.hbm %s1618_s10, 128  ;;  %s1252_s17 = scalar_lea.hbm %s1780_s0, 256 }
  0x8e   : > { %p1248_p12 = scmp.ne.s32.totalorder %s1618_s10, %s1247_s29  ;;  %p1249_p8 = pneg %p1620_p11 }
  0x8f   : > { %p1253_p13 = scmp.lt.u32.totalorder %s1618_s10, %s1780_s0  ;;  %p1254_p0 = scmp.lt.u32.totalorder %s1252_s17, %s1247_s29 }
  0x90   : > { %p1250_p1 = pnand %p1249_p8, %p1248_p12  ;;  %p1256_p5 = scmp.lt.u32.totalorder %s1247_s29, %s1618_s10 }
  0x91   : > { %p1255_p2 = por %p1254_p0, %p1253_p13 }
  0x92   : > { %p1251_p3 = pneg %p1250_p1 }
  0x93   : > { %p1257_p9 = por %p1256_p5, %p1255_p2 }
  0x95   : > { %p1258_p4 = pnand %p1257_p9, %p1251_p3 }
  0x97   : > { %1261 = shalt.err (!%p1258_p4)
}
  0x98   : > { %s1262_s28 = scalar_lea.vmem %s1624_s9, 128  ;;  %s1364_s21 = smov [#allocation2]  }
  0x99   : > { %p1263_p12 = scmp.ne.s32.totalorder %s1624_s9, %s1262_s28  ;;  %s1267_s22 = sshll.u32 %s1364_s21, 4  ;;  %s1268_s22 = int_to_ptr.vmem [resolvable:$false] %s1267_s22 }
  0x9a   : > { %s1269_s16 = scalar_lea.vmem %s1268_s22, 256  ;;  %p1270_p6 = scmp.lt.s32.totalorder %s1624_s9, %s1268_s22 }
  0x9b   : > { %p1265_p1 = pnand %p1263_p12, %p1249_p8  ;;  %p1271_p13 = scmp.lt.s32.totalorder %s1269_s16, %s1262_s28 }
  0x9d   : > { %p1266_p10 = pneg %p1265_p1  ;;  %p1272_p0 = por %p1271_p13, %p1270_p6 }
  0x9f   : > { %p1273_p2 = pnand %p1272_p0, %p1266_p10 }
  0xa1   : > { %1276 = shalt.err (!%p1273_p2)
}
  0xa2   : > { %1030 = dma.hbm_to_vmem [thread:$0]  (!%p1620_p11), %s1618_s10, 128, %s1624_s9, %s291_s11  }
  0xa3   : > { %p1799_p3 = scmp.ne.s32.totalorder %s1791_s8, 0 }
  0xa4   : > { %s1654_s29 = sand.u32 (!%p1799_p3), 1, %s1347_s25  }
  0xa5   : > { %310 = sbr.rel (%p1799_p3) target bundleno = 1535 (0x5ff), region = 48  ;;  %s906_s17 = sshll.u32 (!%p1799_p3), %s1654_s29, 3 }
  0xa6   : > { %s313_s18 = scalar_lea.sflag (!%p1799_p3), [#allocation3], %s1654_s29  ;;  %s316_s20 = scalar_lea.vmem (!%p1799_p3), [#allocation2], %s906_s17 }
  0xac   : > { %1322 = dma.done.wait (%p1600_p7), %s313_s18, 128  }
  0xad   : > { %1324 = vsyncadd (%p1600_p7), %s313_s18, 4294967168  ;;  %p1800_p6 = scmp.eq.s32.totalorder %s1432_s30, 0 }
  0xaf   : > { %1326 = dma.done.wait (%p1800_p6), [#allocation6], 256   ;;  %p1801_p10 = pmov %p1800_p6 }
  0xb0   : > { %p1802_p11 = pmov %p1800_p6 }
  0xb1   : > { %1328 = vsyncadd (%p1801_p10), [#allocation6], 4294967040 }
  0xb2   : > { %1330 = dma.done.wait (%p1802_p11), [#allocation9], 512   ;;  %p1803_p8 = pmov %p1800_p6 }
  0xb3   : > { %p1804_p5 = pmov %p1800_p6 }
  0xb4   : > { %1332 = vsyncadd (%p1803_p8), [#allocation9], 4294966784 }
  0xb5   : > { %1334 = dma.done.wait (%p1804_p5), [#allocation12], 512   ;;  %p1805_p9 = pmov %p1804_p5 }
  0xb6   : > { %v1365_v0 = vmov 0.0   ;;  %vm1366_vm0 = vmmov 0   ;;  %v1091_v1 = vld [vmem:[#allocation5] sm:$0xff]   ;;  %v1682_v2 = vld [vmem:[%s316_s20] sm:$0xff]  ;;  %vm473_vm1 = vcmask 1044480   ;;  %vm383_vm2 = vcmask 130048  }
  0xb7   : > { %1336 = vsyncadd (%p1805_p9), [#allocation12], 4294966784  ;;  %947 = vmatprep.subr.bf16.mxu0 %v1365_v0  ;;  %949 = vmatprep.mubr.msk.bf16.mxu0 %vm1366_vm0, %v1365_v0  ;;  %v372_v3 = vpack.c.bf16 %v1682_v2, %v1682_v2  ;;  %v1092_v4 = vld [vmem:[#allocation7] sm:$0x1f]   ;;  %s1367_s8 = smov 112   ;;  %vm469_vm3 = vcmask 80896   ;;  %v373_v7 = vlaneseq }
  0xb8   : > { %953 = vmatprep.subr.bf16.mxu1 %v1365_v0  ;;  %955 = vmatprep.mubr.msk.bf16.mxu1 %vm1366_vm0, %v1365_v0  ;;  %v475_v5 = vsel %vm473_vm1, %v1092_v4, 0  ;;  %v1698_v10 = vld [vmem:[%s1786_s6] sm:$0xff]  ;;  %vm427_vm4 = vcmask 261120   ;;  %v1093_v36 = vld [vmem:[#allocation10] sm:$0xff]   ;;  %v1094_v37 = vld [vmem:[#allocation10 + $0x8] sm:$0xff]   ;;  %s1368_s9 = smov 90  }
  0xb9   : > { %948 = vmatpush3.bf16.msra.mxu0 %v1091_v1  ;;  %462 = vrot.lane.b32.xlu0 %v372_v3, %s1367_s8  ;;  %v1692_v8 = vshrl.u32 %v373_v7, 7  ;;  %v1095_v62 = vld [vmem:[#allocation8] sm:$0xff]   ;;  %s1369_s13 = smov 102   ;;  %vm718_vm7 = vcmask 523264   ;;  %s929_s11 = sshll.u32 %s1432_s30, 7 }
  0xba   : > { %975 = vmatprep.subr.bf16.mxu0 %v1365_v0  ;;  %954 = vmatpush3.bf16.msra.mxu1 %v475_v5  ;;  %s366_s28 = scalar_lea.vmem [#allocation13], %s906_s17  ;;  %s1736_s18 = scalar_lea.hbm %s1787_s7, %s929_s11 }
  0xbb   : > { %959 = vmatprep.subr.bf16.mxu1 %v1365_v0  ;;  %v375_v9 = vsub.s32 0, %v1692_v8  ;;  %v459_v18 = vsub.s32 3, %v1692_v8  ;;  %v532_v44 = vsub.s32 4, %v1692_v8  ;;  %v537_v45 = vsub.s32 5, %v1692_v8  ;;  %s777_s21 = sshll.u32 %s366_s28, 4  ;;  %s764_s30 = scalar_lea.sflag [#allocation4], %s1654_s29  ;;  %s1738_s21 = int_to_ptr.vmem [resolvable:$true] %s777_s21 }
  0xbc   : > { %950 = vmatmul.mubr.msk.bf16.vlgmr.msra.gmra.mrb[0].mxu0 %vm383_vm2, %v372_v3  ;;  %v444_v47 = vsub.s32 1, %v1692_v8  ;;  %v449_v51 = vsub.s32 2, %v1692_v8  ;;  %v1096_v3 = vld [vmem:[#allocation8 + $0x8] sm:$0xff]   ;;  %s1277_s20 = scalar_lea.vmem %s1738_s21, 128  ;;  %p1806_p4 = scmp.ne.s32.totalorder %s1796_s23, 0 }
  0xbd   : > { %983 = vmatprep.mubr.msk.bf16.mxu0 %vm1366_vm0, %v1365_v0  ;;  %v376_v11 = vrot.slane %v1698_v10, %v375_v9  ;;  %v460_v19 = vrot.slane %v1698_v10, %v459_v18  ;;  %v533_v46 = vrot.slane %v1698_v10, %v532_v44  ;;  %v538_v49 = vrot.slane %v1698_v10, %v537_v45  ;;  %p1278_p7 = scmp.ne.s32.totalorder %s1738_s21, %s1277_s20  ;;  %s1370_s17 = smov [#allocation13]  }
  0xbe   : > { %v445_v53 = vrot.slane %v1698_v10, %v444_v47  ;;  %v450_v56 = vrot.slane %v1698_v10, %v449_v51  ;;  %s1281_s8 = sshll.u32 %s1370_s17, 4  ;;  %s1282_s8 = int_to_ptr.vmem [resolvable:$false] %s1281_s8 }
  0xbf   : > { %p1279_p12 = pnand %p1278_p7, %p1806_p4  ;;  %s1283_s15 = scalar_lea.vmem %s1282_s8, 256 }
  0xc0   : > { %p1284_p13 = scmp.lt.s32.totalorder %s1738_s21, %s1282_s8  ;;  %p1285_p0 = scmp.lt.s32.totalorder %s1283_s15, %s1277_s20 }
  0xc1   : > { %p1280_p1 = pneg %p1279_p12 }
  0xc2   : > { %p1286_p2 = por %p1285_p0, %p1284_p13 }
  0xc4   : > { %p1287_p3 = pnand %p1286_p2, %p1280_p1 }
 0x12b   : > { %v463_v6 = vpop.permute.xlu0 %462 }
 0x12c   : > { %956 = vmatmul.mubr.msk.bf16.vlgmr.msra.gmra.mrb[0].mxu1 %vm469_vm3, %v463_v6 }
 0x12d   : > { %963 = vmatprep.mubr.msk.bf16.mxu1 %vm1366_vm0, %v1365_v0  ;;  %960 = vmatpush3.bf16.msra.mxu1 %v1093_v36 }
 0x12e   : > { %961 = vmatprep.subr.bf16.mxu1 %v1365_v0 }
 0x131   : > { %962 = vmatpush3.bf16.msra.mxu1 %v1094_v37 }
 0x132   : > { %967 = vmatprep.subr.bf16.mxu1 %v1365_v0 }
 0x18f   : > { %v421_v12 = vpop.f32.mrb[0].mxu0 }
 0x190   : > { %v422_v13 = vadd.f32 %v421_v12, %v376_v11  ;;  %v951_v14 = vpop.f32.mrb[1].mxu0  ;;  %v665_v12 = vsub.s32 6, %v1692_v8 }
 0x191   : > { %v424_v15 = vpop.f32.mrb[2].mxu0 }
 0x192   : > { %v428_v16 = vsel %vm427_vm4, %v422_v13, 0.0  ;;  %v952_v17 = vpop.f32.mrb[3].mxu0 }
 0x193   : > { %429 = vadd.xlane.f32.xlu1 %v428_v16 }
 0x1ff   : > { %v511_v20 = vpop.f32.mrb[0].mxu1 }
 0x200   : > { %v512_v21 = vadd.f32 %v511_v20, %v460_v19  ;;  %v957_v22 = vpop.f32.mrb[1].mxu1 }
 0x201   : > { %v514_v23 = vpop.f32.mrb[2].mxu1  ;;  %v1097_v22 = vld [vmem:[#allocation11] sm:$0xff]  }
 0x202   : > { %v958_v24 = vpop.f32.mrb[3].mxu1  ;;  %v517_v25 = vsel %vm427_vm4, %v512_v21, 0.0  ;;  %976 = vmatpush3.bf16.msra.mxu0 %v1097_v22  ;;  %v1098_v23 = vld [vmem:[#allocation11 + $0x8] sm:$0xff]  }
 0x203   : > { %518 = vadd.xlane.f32.xlu0 %v517_v25  ;;  %977 = vmatprep.subr.bf16.mxu0 %v1365_v0  ;;  %v1099_v24 = vld [vmem:[#allocation11 + $0x10] sm:$0xff]  }
 0x206   : > { %978 = vmatpush3.bf16.msra.mxu0 %v1098_v23 }
 0x207   : > { %979 = vmatprep.subr.bf16.mxu0 %v1365_v0 }
 0x20a   : > { %980 = vmatpush3.bf16.msra.mxu0 %v1099_v24 }
 0x20b   : > { %981 = vmatprep.subr.bf16.mxu0 %v1365_v0 }
 0x220   : > { %v430_v26 = vpop.xlane.xlu1 %429 }
 0x221   : > { %v432_v27 = vmul.f32 0.03125, %v430_v26  ;;  %v1100_v26 = vld [vmem:[#allocation11 + $0x18] sm:$0xff]  }
 0x222   : > { %982 = vmatpush3.bf16.msra.mxu0 %v1100_v26 }
 0x223   : > { %v433_v30 = vsub.f32 %v422_v13, %v432_v27  ;;  %v666_v13 = vrot.slane %v1698_v10, %v665_v12 }
 0x225   : > { %v434_v34 = vmul.f32 %v433_v30, %v433_v30 }
 0x227   : > { %v435_v35 = vsel %vm427_vm4, %v434_v34, 0.0 }
 0x290   : > { %v519_v28 = vpop.xlane.xlu0 %518 }
 0x291   : > { %v520_v29 = vmul.f32 0.03125, %v519_v28 }
 0x293   : > { %v521_v31 = vsub.f32 %v512_v21, %v520_v29 }
 0x295   : > { %v522_v32 = vmul.f32 %v521_v31, %v521_v31 }
 0x297   : > { %v523_v33 = vsel %vm427_vm4, %v522_v32, 0.0  ;;  %v692_v32 = vsub.s32 7, %v1692_v8 }
 0x298   : > { %524 = vadd.xlane.f32.xlu1 %v523_v33 }
 0x299   : > { %v693_v33 = vrot.slane %v1698_v10, %v692_v32 }
 0x29c   : > { %436 = vadd.xlane.f32.xlu1 %v435_v35 }
 0x325   : > { %v525_v38 = vpop.xlane.xlu1 %524 }
 0x326   : > { %v526_v39 = vmul.f32 0.03125, %v525_v38 }
 0x328   : > { %v527_v40 = vadd.f32 1e-05, %v526_v39 }
 0x329   : > { %v437_v41 = vpop.xlane.xlu1 %436 }
 0x32a   : > { %1101 = vrsqrt.f32 %v527_v40  ;;  %v438_v42 = vmul.f32 0.03125, %v437_v41 }
 0x32c   : > { %v439_v43 = vadd.f32 1e-05, %v438_v42 }
 0x32e   : > { %1103 = vrsqrt.f32 %v439_v43 }
 0x334   : > { %v1102_v48 = vpop.eup %1101 }
 0x335   : > { %v529_v50 = vmul.f32 %v1102_v48, %v521_v31 }
 0x337   : > { %v534_v52 = vmul.f32 %v533_v46, %v529_v50 }
 0x338   : > { %v1104_v54 = vpop.eup %1103 }
 0x339   : > { %v539_v55 = vadd.f32 %v538_v49, %v534_v52  ;;  %v441_v57 = vmul.f32 %v1104_v54, %v433_v30 }
 0x33b   : > { %v446_v58 = vmul.f32 %v445_v53, %v441_v57  ;;  %vm540_vm5 = vcmp.gt.f32.partialorder %v539_v55, 0.0  ;;  %v541_v59 = vmul.f32 0.2, %v539_v55 }
 0x33d   : > { %v451_v60 = vadd.f32 %v450_v56, %v446_v58  ;;  %v542_v61 = vsel %vm540_vm5, %v539_v55, %v541_v59 }
 0x33e   : > { %v552_v63 = vpack.c.bf16 %v542_v61, %v542_v61 }
 0x33f   : > { %v453_v1 = vmul.f32 0.2, %v451_v60  ;;  %vm452_vm6 = vcmp.gt.f32.partialorder %v451_v60, 0.0 }
 0x340   : > { %964 = vmatmul.mubr.msk.bf16.vlgmr.msra.gmra.mrb[4].mxu1 %vm427_vm4, %v552_v63 }
 0x341   : > { %968 = vmatpush3.bf16.msra.mxu1 %v1095_v62  ;;  %971 = vmatprep.mubr.msk.bf16.mxu1 %vm1366_vm0, %v1365_v0  ;;  %v454_v4 = vsel %vm452_vm6, %v451_v60, %v453_v1 }
 0x342   : > { %969 = vmatprep.subr.bf16.mxu1 %v1365_v0  ;;  %v547_v5 = vpack.c.bf16 %v454_v4, %v454_v4 }
 0x345   : > { %970 = vmatpush3.bf16.msra.mxu1 %v1096_v3 }
 0x348   : > { %972 = vmatmul.mubr.msk.bf16.vlgmr.msra.gmra.mrb[8].mxu1 %vm427_vm4, %v547_v5 }
 0x413   : > { %v602_v6 = vpop.f32.mrb[4].mxu1 }
 0x414   : > { %v965_v7 = vpop.f32.mrb[5].mxu1 }
 0x415   : > { %v605_v9 = vpop.f32.mrb[6].mxu1 }
 0x416   : > { %v966_v11 = vpop.f32.mrb[7].mxu1 }
 0x41b   : > { %v657_v14 = vpop.f32.mrb[8].mxu1 }
 0x41c   : > { %v658_v15 = vadd.f32 %v657_v14, %v602_v6  ;;  %v973_v16 = vpop.f32.mrb[9].mxu1 }
 0x41d   : > { %v660_v17 = vpop.f32.mrb[10].mxu1 }
 0x41e   : > { %v667_v18 = vadd.f32 %v666_v13, %v658_v15  ;;  %v974_v19 = vpop.f32.mrb[11].mxu1 }
 0x420   : > { %v668_v20 = vmul.f32 0.5, %v667_v18 }
 0x422   : > { %v669_v21 = vmul.f32 1.442695, %v668_v20 }
 0x424   : > { %1105 = vpow2.f32 %v669_v21 }
 0x42e   : > { %v1106_v25 = vpop.eup %1105 }
 0x42f   : > { %672 = vrot.lane.b32.xlu1 %v1106_v25, %s1368_s9 }
 0x4a1   : > { %v673_v27 = vpop.permute.xlu1 %672 }
 0x4a2   : > { %v675_v28 = vmul.f32 %v673_v27, %v1682_v2 }
 0x4a4   : > { %677 = vrot.lane.b32.xlu1 %v675_v28, %s1369_s13 }
 0x516   : > { %v678_v29 = vpop.permute.xlu1 %677 }
 0x517   : > { %v680_v30 = vadd.f32 %v678_v29, %v667_v18 }
 0x519   : > { %v689_v31 = vpack.c.bf16 %v680_v30, %v680_v30 }
 0x51b   : > { %984 = vmatmul.mubr.msk.bf16.vlgmr.msra.gmra.mrb[4].mxu0 %vm718_vm7, %v689_v31 }
 0x5ee   : > { %v756_v0 = vpop.f32.mrb[4].mxu0 }
 0x5ef   : > { %v757_v34 = vadd.f32 %v756_v0, %v693_v33  ;;  %v985_v2 = vpop.f32.mrb[5].mxu0 }
 0x5f0   : > { %v759_v8 = vpop.f32.mrb[6].mxu0 }
 0x5f1   : > { %762 = vst [vmem:[%s366_s28] sm:$0xff] %v757_v34  ;;  %v986_v10 = vpop.f32.mrb[7].mxu0 }
 0x5f2   : > { %1290 = shalt.err (!%p1287_p3)
}
 0x5f3   : > { %s1291_s29 = scalar_lea.hbm %s1736_s18, 128  ;;  %s1295_s13 = scalar_lea.hbm %s1787_s7, 256 }
 0x5f4   : > { %p1292_p6 = scmp.ne.s32.totalorder %s1736_s18, %s1291_s29  ;;  %p1296_p8 = scmp.lt.u32.totalorder %s1736_s18, %s1787_s7 }
 0x5f5   : > { %p1297_p5 = scmp.lt.u32.totalorder %s1295_s13, %s1291_s29  ;;  %p1299_p7 = scmp.lt.u32.totalorder %s1291_s29, %s1736_s18 }
 0x5f6   : > { %p1293_p10 = pnand %p1292_p6, %p1806_p4 }
 0x5f7   : > { %p1298_p9 = por %p1297_p5, %p1296_p8 }
 0x5f8   : > { %p1294_p11 = pneg %p1293_p10 }
 0x5f9   : > { %p1300_p12 = por %p1299_p7, %p1298_p9 }
 0x5fb   : > { %p1301_p1 = pnand %p1300_p12, %p1294_p11 }
 0x5fd   : > { %1304 = shalt.err (!%p1301_p1)
}
 0x5fe   : > { %1009 = dma.vmem_to_hbm [thread:$0]  (%p1806_p4), %s1738_s21, 128, %s1736_s18, %s764_s30  }
 0x5ff PF: > { %s789_s22 = sand.u32 1, %s1343_s24   ;;  %p1807_p13 = scmp.ne.s32.totalorder %s1797_s14, 0 }
 0x600   : > { %p1808_p0 = scmp.ge.s32.totalorder %s1355_s27, 2  ;;  %s790_s16 = scalar_lea.sflag [#allocation4], %s789_s22 }
 0x602   : > { %p1032_p2 = pnand %p1808_p0, %p1807_p13 }
 0x604   : > { %1338 = dma.done.wait (!%p1032_p2), %s790_s16, 128  }
 0x605   : > { %1340 = vsyncadd (!%p1032_p2), %s790_s16, 4294967168  ;;  %p23_p3 = scmp.ge.s32.totalorder %s1584_s19, 4   ;;  %s1809_s24 = smov %s1347_s25 }
 0x606   : > { %s1810_s25 = smov %s1351_s26  ;;  %s1811_s26 = smov %s1596_s12 }
 0x607   : > { %s1812_s27 = smov %s1584_s19  ;;  %25 = sbr.rel (!%p23_p3) target bundleno = 8 (0x8), region = 113 }
 0x60e   :  { %795 = vsyncpa [#allocation3], 1 }
 0x60f   :  { %797 = vsyncpa [#allocation3 + $0x1], 1 }
 0x610   :  { %798 = vsyncpa [#allocation6], 1 }
 0x611   :  { %799 = vsyncpa [#allocation9], 1 }
 0x612   :  { %800 = vsyncpa [#allocation12], 1 }
 0x613   :  { %801 = vsyncpa [#allocation4], 1 }
 0x614   :  { %803 = vsyncpa [#allocation4 + $0x1], 1 }

</bundles_post_ra>
